<compile_context>
chip_gen: v5e
topology: v5e:2x2
jax: 0.10.0
libtpu: 0.0.40
codegen_flags: <defaults>
</compile_context>

<pallas_src>
import jax
import jax.numpy as jnp
from jax.experimental import pallas as pl
from jax.experimental.pallas import tpu as pltpu

HIDDEN = 64       # torch module's hidden width
LANE = 128        # TPU lane width
SUBLANE = 8       # f32 sublane count


def _round_up(n, m):
    return ((n + m - 1) // m) * m


def _mlp_kernel(x_ref, w_ref, b_ref, o_ref):
    """Fused 3-layer MLP on one (TB, in_dim) batch tile.

    x_ref: (tb, in_dim)            -- unpadded feature width (K = in_dim)
    w_ref: (kp8 + 2*128, width)    -- stacked lane-padded weights [W1; W2; W3]
    b_ref: (8, width) f32          -- rows 0/1/2 hold b1/b2/b3
    o_ref: (tb, out_dim)           -- unpadded output width
    Hidden dims are padded to 128 lanes so the layer-1/2/3 matmuls use full MXU
    column blocks; padded lanes stay exactly 0 through ReLU (zero weights/bias).
    """
    in_dim = x_ref.shape[1]
    kp8 = _round_up(in_dim, SUBLANE)          # sublane-aligned row block of W1
    hp = _round_up(HIDDEN, LANE)              # padded hidden (=128)
    width = w_ref.shape[1]                    # slab lane width (=128 here)
    out_dim = o_ref.shape[1]
    w_dtype = w_ref.dtype

    def dense(h, w, b, relu):
        if h.dtype != w_dtype:                # bf16 fast path: MXU operands in param dtype
            h = h.astype(w_dtype)
        y = jnp.dot(h, w, preferred_element_type=jnp.float32) + b   # f32 acc + f32 bias
        return jnp.maximum(y, 0.0) if relu else y

    h1 = dense(x_ref[...], w_ref[0:in_dim, 0:hp],           b_ref[0:1, 0:hp], relu=True)
    h2 = dense(h1,         w_ref[kp8:kp8 + hp, 0:hp],        b_ref[1:2, 0:hp], relu=True)
    y = dense(h2,          w_ref[kp8 + hp:kp8 + 2 * hp, :],  b_ref[2:3, :],    relu=False)
    # Store only the real output lanes (masked vst; far less HBM writeback than
    # a 128-wide padded f32 output when out_dim is small).
    o_ref[...] = y[:, 0:out_dim] if out_dim != width else y


def init_params(key, in_dim, out_dim):
    """Deterministic init mimicking nn.Linear's U(-1/sqrt(fan_in), +1/sqrt(fan_in))."""
    ks = jax.random.split(key, 6)

    def linear(kw, kb, fan_in, fan_out):
        bound = 1.0 / jnp.sqrt(fan_in)
        w = jax.random.uniform(kw, (fan_in, fan_out), jnp.float32, -bound, bound)
        b = jax.random.uniform(kb, (1, fan_out), jnp.float32, -bound, bound)
        return w, b

    w1, b1 = linear(ks[0], ks[1], in_dim, HIDDEN)
    w2, b2 = linear(ks[2], ks[3], HIDDEN, HIDDEN)
    w3, b3 = linear(ks[4], ks[5], HIDDEN, out_dim)
    return {"w1": w1, "b1": b1, "w2": w2, "b2": b2, "w3": w3, "b3": b3}


def pack_params(params, *, param_dtype=jnp.float32):
    """Pack the three weights into one lane-padded slab and the three biases into
    one (8, width) slab.  Done once, outside the kernel.  Pad regions are zero
    (required: layer 2/3 read the padded rows/lanes).
    param_dtype=jnp.bfloat16 is the recommended setting on v6e/v7x; keep f32 on v5e.
    """
    w1, b1 = params["w1"], params["b1"]      # (in,64), (1,64)
    w2, b2 = params["w2"], params["b2"]      # (64,64), (1,64)
    w3, b3 = params["w3"], params["b3"]      # (64,out), (1,out)
    in_dim, out_dim = w1.shape[0], w3.shape[1]

    kp8 = _round_up(in_dim, SUBLANE)
    hp = _round_up(HIDDEN, LANE)
    width = max(hp, _round_up(out_dim, LANE))

    w_slab = jnp.zeros((kp8 + 2 * hp, width), jnp.float32)
    w_slab = w_slab.at[0:in_dim, 0:HIDDEN].set(w1)
    w_slab = w_slab.at[kp8:kp8 + HIDDEN, 0:HIDDEN].set(w2)
    w_slab = w_slab.at[kp8 + hp:kp8 + hp + HIDDEN, 0:out_dim].set(w3)

    b_slab = jnp.zeros((SUBLANE, width), jnp.float32)
    b_slab = b_slab.at[0, 0:HIDDEN].set(b1[0])
    b_slab = b_slab.at[1, 0:HIDDEN].set(b2[0])
    b_slab = b_slab.at[2, 0:out_dim].set(b3[0])

    return {
        "w": w_slab.astype(param_dtype),     # bf16 here halves operand DMA on v6e/v7x
        "b": b_slab,                         # biases stay f32 (added post f32 accumulation)
        "in_dim": in_dim, "out_dim": out_dim,
    }


def network_forward(x, packed, *, tile_b=2048):
    """Run the 3-layer MLP forward pass as a single batch-tiled Pallas kernel."""
    B, in_dim = x.shape
    assert in_dim == packed["in_dim"]
    out_dim = packed["out_dim"]
    w, b = packed["w"], packed["b"]

    # ---- batch tile selection ----
    b16 = _round_up(B, 16)
    if b16 <= 64:
        # Tiny-batch inference (DQN action selection): one grid step, no pipeline
        # prologue, and no batch pad when B is already a multiple of 16.
        tb = b16
    else:
        # Large tiles amortize the ~0.35 us/step overhead, but keep >= 2 grid
        # steps so the ("parallel",) axis splits across both v7x TensorCores.
        half = _round_up(-(-B // 2), 16)
        tb = max(16, min(_round_up(tile_b, 16), half))
    bp = _round_up(B, tb)

    xp = x
    if xp.dtype != w.dtype:
        xp = xp.astype(w.dtype)                       # bf16 activations on the bf16 path
    if bp != B:
        xp = jnp.pad(xp, ((0, bp - B), (0, 0)))       # batch pad only; NO lane pad

    itemsize = jnp.dtype(w.dtype).itemsize
    cost = pl.CostEstimate(
        flops=2 * bp * (in_dim * HIDDEN + HIDDEN * HIDDEN + HIDDEN * out_dim),
        transcendentals=0,
        bytes_accessed=(bp * in_dim * itemsize      # x read
                        + w.size * itemsize         # resident weight slab (read once)
                        + b.size * 4                # bias slab
                        + bp * out_dim * 4),        # output write (f32, unpadded)
    )

    out = pl.pallas_call(
        _mlp_kernel,
        out_shape=jax.ShapeDtypeStruct((bp, out_dim), jnp.float32),
        grid=(bp // tb,),
        in_specs=[
            pl.BlockSpec((tb, in_dim), lambda i: (i, 0)),   # batch tile: pipelined, unpadded K
            pl.BlockSpec(w.shape, lambda i: (0, 0)),        # weight slab: VMEM-resident
            pl.BlockSpec(b.shape, lambda i: (0, 0)),        # bias slab:   VMEM-resident
        ],
        out_specs=pl.BlockSpec((tb, out_dim), lambda i: (i, 0)),   # unpadded output width
        compiler_params=pltpu.CompilerParams(
            dimension_semantics=("parallel",),              # batch tiles shard across TCs on v7x
        ),
        cost_estimate=cost,
    )(xp, w, b)
    return out if bp == B else out[:B]


def _reference_forward(x, p):
    h1 = jnp.maximum(x @ p["w1"] + p["b1"], 0.0)
    h2 = jnp.maximum(h1 @ p["w2"] + p["b2"], 0.0)
    return h2 @ p["w3"] + p["b3"]


if __name__ == "__main__":
    key = jax.random.PRNGKey(0)
    k_params, k_x, k_x2 = jax.random.split(key, 3)

    # Small DQN-like shapes: batch of 8 observations of dim 16, 4 actions.
    batch, in_dim, out_dim = 8, 16, 4
    params = init_params(k_params, in_dim, out_dim)
    x = jax.random.normal(k_x, (batch, in_dim), jnp.float32)
    ref = _reference_forward(x, params)

    # 1) f32 path, tiny-batch single tile (tight tolerance).
    packed_f32 = pack_params(params, param_dtype=jnp.float32)
    out = jax.block_until_ready(network_forward(x, packed_f32))
    assert out.shape == (batch, out_dim)
    assert jnp.allclose(out, ref, atol=1e-5, rtol=1e-5), "f32 mismatch vs reference"

    # 2) Multi-tile batch grid (exercises pipelining + partial final tile + 2-TC split).
    x_big = jax.random.normal(k_x2, (300, in_dim), jnp.float32)
    out_big = jax.block_until_ready(network_forward(x_big, packed_f32, tile_b=128))
    ref_big = _reference_forward(x_big, params)
    assert out_big.shape == (300, out_dim)
    assert jnp.allclose(out_big, ref_big, atol=1e-5, rtol=1e-5), "tiled mismatch vs reference"

    # 3) bf16-operand path (recommended default on v6e/v7x), f32 accumulation kept.
    packed_bf16 = pack_params(params, param_dtype=jnp.bfloat16)
    out_bf16 = jax.block_until_ready(network_forward(x, packed_bf16))
    assert jnp.allclose(out_bf16, ref, atol=5e-2, rtol=5e-2), "bf16 mismatch vs reference"

    print("KERNEL_OK")
</pallas_src>

<mosaic_0001>
module attributes {stable_mosaic.version = 11 : i64} {
  func.func @_mlp_kernel(%arg0: i32, %arg1: memref<16x16xf32, #tpu.memory_space<vmem>>, %arg2: memref<272x128xf32, #tpu.memory_space<vmem>>, %arg3: memref<8x128xf32, #tpu.memory_space<vmem>>, %arg4: memref<16x4xf32, #tpu.memory_space<vmem>>) attributes {dimension_semantics = [#tpu.dimension_semantics<parallel>], iteration_bounds = array<i64: 1>, scalar_prefetch = 0 : i64, scratch_operands = 0 : i64, tpu.core_type = #tpu.core_type<tc>, window_params = [{transform_indices = @transform_0, window_bounds = array<i64: 16, 16>}, {pipeline_mode = #tpu.pipeline_mode<synchronous>, transform_indices = @transform_1, window_bounds = array<i64: 272, 128>}, {pipeline_mode = #tpu.pipeline_mode<synchronous>, transform_indices = @transform_2, window_bounds = array<i64: 8, 128>}, {transform_indices = @transform_3, window_bounds = array<i64: 16, 4>}]} {
    %c0 = arith.constant 0 : index
    %c0_0 = arith.constant 0 : index
    %0 = vector.load %arg1[%c0, %c0_0] : memref<16x16xf32, #tpu.memory_space<vmem>>, vector<16x16xf32>
    %c0_1 = arith.constant 0 : index
    %c0_2 = arith.constant 0 : index
    %1 = vector.load %arg2[%c0_1, %c0_2] : memref<272x128xf32, #tpu.memory_space<vmem>>, vector<16x128xf32>
    %c0_3 = arith.constant 0 : index
    %c0_4 = arith.constant 0 : index
    %2 = vector.load %arg3[%c0_3, %c0_4] : memref<8x128xf32, #tpu.memory_space<vmem>>, vector<1x128xf32>
    %cst = arith.constant dense<0.000000e+00> : vector<16x128xf32>
    %3 = tpu.matmul %0, %1, %cst {dimension_numbers = #tpu.dot_dimension_numbers<[1], [0], [0], [1], [0, 0, 1, 1], [], []>} : vector<16x16xf32>, vector<16x128xf32>, vector<16x128xf32> -> vector<16x128xf32>
    %4 = vector.broadcast %2 : vector<1x128xf32> to vector<16x128xf32>
    %5 = arith.addf %3, %4 : vector<16x128xf32>
    %cst_5 = arith.constant 0.000000e+00 : f32
    %6 = vector.broadcast %cst_5 : f32 to vector<16x128xf32>
    %7 = arith.maximumf %5, %6 : vector<16x128xf32>
    %c16 = arith.constant 16 : index
    %c0_6 = arith.constant 0 : index
    %8 = vector.load %arg2[%c16, %c0_6] : memref<272x128xf32, #tpu.memory_space<vmem>>, vector<128x128xf32>
    %c1 = arith.constant 1 : index
    %c0_7 = arith.constant 0 : index
    %9 = vector.load %arg3[%c1, %c0_7] : memref<8x128xf32, #tpu.memory_space<vmem>>, vector<1x128xf32>
    %cst_8 = arith.constant dense<0.000000e+00> : vector<16x128xf32>
    %10 = tpu.matmul %7, %8, %cst_8 {dimension_numbers = #tpu.dot_dimension_numbers<[1], [0], [0], [1], [0, 0, 1, 1], [], []>} : vector<16x128xf32>, vector<128x128xf32>, vector<16x128xf32> -> vector<16x128xf32>
    %11 = vector.broadcast %9 : vector<1x128xf32> to vector<16x128xf32>
    %12 = arith.addf %10, %11 : vector<16x128xf32>
    %cst_9 = arith.constant 0.000000e+00 : f32
    %13 = vector.broadcast %cst_9 : f32 to vector<16x128xf32>
    %14 = arith.maximumf %12, %13 : vector<16x128xf32>
    %c144 = arith.constant 144 : index
    %c0_10 = arith.constant 0 : index
    %15 = vector.load %arg2[%c144, %c0_10] : memref<272x128xf32, #tpu.memory_space<vmem>>, vector<128x128xf32>
    %c2 = arith.constant 2 : index
    %c0_11 = arith.constant 0 : index
    %16 = vector.load %arg3[%c2, %c0_11] : memref<8x128xf32, #tpu.memory_space<vmem>>, vector<1x128xf32>
    %cst_12 = arith.constant dense<0.000000e+00> : vector<16x128xf32>
    %17 = tpu.matmul %14, %15, %cst_12 {dimension_numbers = #tpu.dot_dimension_numbers<[1], [0], [0], [1], [0, 0, 1, 1], [], []>} : vector<16x128xf32>, vector<128x128xf32>, vector<16x128xf32> -> vector<16x128xf32>
    %18 = vector.broadcast %16 : vector<1x128xf32> to vector<16x128xf32>
    %19 = arith.addf %17, %18 : vector<16x128xf32>
    %20 = vector.extract_strided_slice %19 {offsets = [0, 0], sizes = [16, 4], strides = [1, 1]} : vector<16x128xf32> to vector<16x4xf32>
    %c0_13 = arith.constant 0 : index
    %c0_14 = arith.constant 0 : index
    %21 = vector.load %arg4[%c0_13, %c0_14] : memref<16x4xf32, #tpu.memory_space<vmem>>, vector<16x4xf32>
    tpu.vector_store %arg4[%c0_13, %c0_14], %20 {strides = array<i32>} : memref<16x4xf32, #tpu.memory_space<vmem>>, vector<16x4xf32>,
    return
  }
  func.func @transform_0(%arg0: i32) -> (i32, i32) {
    %c0_i32 = arith.constant 0 : i32
    %c0_i32_0 = arith.constant 0 : i32
    return %arg0, %c0_i32 : i32, i32
  }
  func.func @transform_1(%arg0: i32) -> (i32, i32) {
    %c0_i32 = arith.constant 0 : i32
    %c0_i32_0 = arith.constant 0 : i32
    %c0_i32_1 = arith.constant 0 : i32
    return %c0_i32, %c0_i32_0 : i32, i32
  }
  func.func @transform_2(%arg0: i32) -> (i32, i32) {
    %c0_i32 = arith.constant 0 : i32
    %c0_i32_0 = arith.constant 0 : i32
    %c0_i32_1 = arith.constant 0 : i32
    return %c0_i32, %c0_i32_0 : i32, i32
  }
  func.func @transform_3(%arg0: i32) -> (i32, i32) {
    %c0_i32 = arith.constant 0 : i32
    %c0_i32_0 = arith.constant 0 : i32
    return %arg0, %c0_i32 : i32, i32
  }
}

</mosaic_0001>

<bundles_post_ra>
// kernel: tpu_custom_call.1
= control target key start
LH: loop header
LB: loop body
LE: loop exit
PB: predicated region body
PF: predicated region fallthrough
CT: control target
= control target key end

     0   :  { %8 = vsyncpa [#allocation3], 0  ;;  %s350_s0 = inlined_call_operand.hbm [shape: f32[16,16], index: 0, kind: input, shape index: {}]   ;;  %s351_s1 = inlined_call_operand.hbm [shape: f32[272,128], index: 1, kind: input, shape index: {}]   ;;  %s352_s2 = inlined_call_operand.hbm [shape: f32[8,128], index: 2, kind: input, shape index: {}]   ;;  %s353_s3 = inlined_call_operand.vmem [shape: f32[16,4], index: 3, kind: output, shape index: {}]  }
   0x1   :  { %9 = vsyncpa [#allocation5], 0  ;;  %s27_s14 = sshll.u32 %s351_s1, 4  ;;  %s308_s15 = smov [#allocation4]   ;;  %s28_s14 = int_to_ptr.hbm [resolvable:$true] %s27_s14 }
   0x2   :  { %s29_s16 = sshll.u32 %s308_s15, 4  ;;  %s14_s19 = sshll.u32 %s350_s0, 4  ;;  %s30_s16 = int_to_ptr.vmem [resolvable:$true] %s29_s16  ;;  %s15_s19 = int_to_ptr.hbm [resolvable:$true] %s14_s19 }
   0x3   :  { %s309_s20 = smov 128   ;;  %s310_s21 = smov 8  }
   0x4   :  { %35 = dma.hbm_to_vmem [thread:$0]  %s28_s14, 4352, %s30_s16, [#allocation5], %s309_s20, %s309_s20, %s310_s21  }
   0x5   :  { %s311_s22 = smov [#allocation2]   ;;  %s41_s26 = sshll.u32 %s352_s2, 4  ;;  %s42_s26 = int_to_ptr.hbm [resolvable:$true] %s41_s26 }
   0x6   :  { %s16_s23 = sshll.u32 %s311_s22, 4  ;;  %s312_s1 = smov [#allocation6]   ;;  %s17_s23 = int_to_ptr.vmem [resolvable:$true] %s16_s23 }
   0x7   :  { %22 = dma.hbm_to_vmem [thread:$0]  %s15_s19, 256, %s17_s23, [#allocation3], %s309_s20, %s309_s20, %s310_s21  }
   0x8   :  { %s43_s27 = sshll.u32 %s312_s1, 4  ;;  %s44_s27 = int_to_ptr.vmem [resolvable:$true] %s43_s27 }
   0x9   :  { %46 = dma.hbm_to_vmem [thread:$0]  %s42_s26, 128, %s44_s27, [#allocation5]  }
   0xa   :  { %304 = dma.done.wait [#allocation3], 256  }
   0xb   :  { %305 = vsyncadd [#allocation3], 4294967040 }
   0xc   :  { %306 = dma.done.wait [#allocation5], 4480  }
   0xd   :  { %307 = vsyncadd [#allocation5], 4294962816  ;;  %v62_v0 = vld [vmem:[#allocation4 + $0x8] sm:$0xff]  ;;  %v61_v1 = vld [vmem:[#allocation4] sm:$0xff]  ;;  %vm65_vm0 = vcmask 130048   ;;  %vm181_vm1 = vcmask 31744  }
   0xe   :  { %86 = vmatpush.msra.mxu0 %v62_v0  ;;  %v59_v2 = vld [vmem:[#allocation2] sm:$0xff]  ;;  %v112_v3 = vld [vmem:[#allocation4 + $0x88] sm:$0xff]  ;;  %v111_v4 = vld [vmem:[#allocation4 + $0x80] sm:$0xff] }
   0xf   :  { %115 = vmatpush.msra.mxu1 %v112_v3  ;;  %192 = vmatpush.msra.mxu3 %v112_v3  ;;  %v110_v5 = vld [vmem:[#allocation4 + $0x78] sm:$0xff]  ;;  %v109_v6 = vld [vmem:[#allocation4 + $0x70] sm:$0xff]  ;;  %v108_v7 = vld [vmem:[#allocation4 + $0x68] sm:$0xff] }
  0x10   :  { %87 = vmatpush.msra.mxu0 %v61_v1  ;;  %v60_v8 = vld [vmem:[#allocation2 + $0x8] sm:$0xff]  ;;  %v107_v9 = vld [vmem:[#allocation4 + $0x60] sm:$0xff]  ;;  %v105_v11 = vld [vmem:[#allocation4 + $0x50] sm:$0xff] }
  0x11   :  { %190 = vmatmul.msk.f32.vlgmr.msra.gmra.mxu0 %vm65_vm0, %v59_v2  ;;  %116 = vmatpush.msra.mxu1 %v111_v4  ;;  %v106_v10 = vld [vmem:[#allocation4 + $0x58] sm:$0xff]  ;;  %v104_v12 = vld [vmem:[#allocation4 + $0x48] sm:$0xff]  ;;  %v103_v13 = vld [vmem:[#allocation4 + $0x40] sm:$0xff] }
  0x12   :  { %193 = vmatpush.msra.mxu3 %v111_v4  ;;  %v102_v14 = vld [vmem:[#allocation4 + $0x38] sm:$0xff]  ;;  %v101_v15 = vld [vmem:[#allocation4 + $0x30] sm:$0xff]  ;;  %v100_v16 = vld [vmem:[#allocation4 + $0x28] sm:$0xff] }
  0x13   :  { %117 = vmatpush.msra.mxu1 %v110_v5  ;;  %v99_v17 = vld [vmem:[#allocation4 + $0x20] sm:$0xff]  ;;  %v98_v18 = vld [vmem:[#allocation4 + $0x18] sm:$0xff]  ;;  %v97_v19 = vld [vmem:[#allocation4 + $0x10] sm:$0xff] }
  0x14   :  { %194 = vmatpush.msra.mxu3 %v110_v5  ;;  %v155_v20 = vld [vmem:[#allocation4 + $0x108] sm:$0xff]  ;;  %v154_v21 = vld [vmem:[#allocation4 + $0x100] sm:$0xff]  ;;  %v153_v22 = vld [vmem:[#allocation4 + $0xf8] sm:$0xff] }
  0x15   :  { %118 = vmatpush.msra.mxu1 %v109_v6  ;;  %158 = vmatpush.msrb.mxu0 %v155_v20  ;;  %v152_v23 = vld [vmem:[#allocation4 + $0xf0] sm:$0xff]  ;;  %v151_v24 = vld [vmem:[#allocation4 + $0xe8] sm:$0xff]  ;;  %v150_v25 = vld [vmem:[#allocation4 + $0xe0] sm:$0xff] }
  0x16   :  { %195 = vmatpush.msra.mxu3 %v109_v6  ;;  %208 = vmatpush.msra.mxu2 %v155_v20  ;;  %v149_v26 = vld [vmem:[#allocation4 + $0xd8] sm:$0xff]  ;;  %v148_v27 = vld [vmem:[#allocation4 + $0xd0] sm:$0xff]  ;;  %v147_v28 = vld [vmem:[#allocation4 + $0xc8] sm:$0xff] }
  0x17   :  { %119 = vmatpush.msra.mxu1 %v108_v7  ;;  %159 = vmatpush.msrb.mxu0 %v154_v21  ;;  %v229_v29 = vld [vmem:[#allocation6] ss:$0 sm:$0xff]  ;;  %v146_v30 = vld [vmem:[#allocation4 + $0xc0] sm:$0xff]  ;;  %v145_v31 = vld [vmem:[#allocation4 + $0xb8] sm:$0xff] }
  0x18   :  { %196 = vmatpush.msra.mxu3 %v108_v7  ;;  %209 = vmatpush.msra.mxu2 %v154_v21  ;;  %v144_v34 = vld [vmem:[#allocation4 + $0xb0] sm:$0xff]  ;;  %v143_v36 = vld [vmem:[#allocation4 + $0xa8] sm:$0xff]  ;;  %v142_v40 = vld [vmem:[#allocation4 + $0xa0] sm:$0xff] }
  0x19   :  { %191 = vmatmul.msk.f32.gmra.mxu0 %vm65_vm0, %v60_v8  ;;  %120 = vmatpush.msra.mxu1 %v107_v9  ;;  %v141_v41 = vld [vmem:[#allocation4 + $0x98] sm:$0xff]  ;;  %v140_v42 = vld [vmem:[#allocation4 + $0x90] sm:$0xff] }
  0x1a   :  { %197 = vmatpush.msra.mxu3 %v107_v9  ;;  %160 = vmatpush.msrb.mxu0 %v153_v22  ;;  %v230_v43 = vld [vmem:[#allocation6 + $0x1] ss:$0 sm:$0xff]  ;;  %v231_v50 = vld [vmem:[#allocation6 + $0x2] ss:$0 sm:$0xff] }
  0x1b   :  { %121 = vmatpush.msra.mxu1 %v106_v10  ;;  %210 = vmatpush.msra.mxu2 %v153_v22 }
  0x1c   :  { %198 = vmatpush.msra.mxu3 %v106_v10  ;;  %161 = vmatpush.msrb.mxu0 %v152_v23 }
  0x1d   :  { %122 = vmatpush.msra.mxu1 %v105_v11  ;;  %211 = vmatpush.msra.mxu2 %v152_v23 }
  0x1e   :  { %199 = vmatpush.msra.mxu3 %v105_v11  ;;  %162 = vmatpush.msrb.mxu0 %v151_v24 }
  0x1f   :  { %123 = vmatpush.msra.mxu1 %v104_v12  ;;  %212 = vmatpush.msra.mxu2 %v151_v24 }
  0x20   :  { %200 = vmatpush.msra.mxu3 %v104_v12  ;;  %163 = vmatpush.msrb.mxu0 %v150_v25 }
  0x21   :  { %124 = vmatpush.msra.mxu1 %v103_v13  ;;  %213 = vmatpush.msra.mxu2 %v150_v25 }
  0x22   :  { %201 = vmatpush.msra.mxu3 %v103_v13  ;;  %164 = vmatpush.msrb.mxu0 %v149_v26 }
  0x23   :  { %125 = vmatpush.msra.mxu1 %v102_v14  ;;  %214 = vmatpush.msra.mxu2 %v149_v26 }
  0x24   :  { %202 = vmatpush.msra.mxu3 %v102_v14  ;;  %165 = vmatpush.msrb.mxu0 %v148_v27 }
  0x25   :  { %126 = vmatpush.msra.mxu1 %v101_v15  ;;  %215 = vmatpush.msra.mxu2 %v148_v27 }
  0x26   :  { %203 = vmatpush.msra.mxu3 %v101_v15  ;;  %166 = vmatpush.msrb.mxu0 %v147_v28 }
  0x27   :  { %127 = vmatpush.msra.mxu1 %v100_v16  ;;  %216 = vmatpush.msra.mxu2 %v147_v28 }
  0x28   :  { %204 = vmatpush.msra.mxu3 %v100_v16  ;;  %167 = vmatpush.msrb.mxu0 %v146_v30 }
  0x29   :  { %128 = vmatpush.msra.mxu1 %v99_v17  ;;  %217 = vmatpush.msra.mxu2 %v146_v30 }
  0x2a   :  { %205 = vmatpush.msra.mxu3 %v99_v17  ;;  %168 = vmatpush.msrb.mxu0 %v145_v31 }
  0x2b   :  { %129 = vmatpush.msra.mxu1 %v98_v18  ;;  %218 = vmatpush.msra.mxu2 %v145_v31 }
  0x2c   :  { %206 = vmatpush.msra.mxu3 %v98_v18  ;;  %169 = vmatpush.msrb.mxu0 %v144_v34 }
  0x2d   :  { %130 = vmatpush.msra.mxu1 %v97_v19  ;;  %219 = vmatpush.msra.mxu2 %v144_v34 }
  0x2e   :  { %207 = vmatpush.msra.mxu3 %v97_v19  ;;  %170 = vmatpush.msrb.mxu0 %v143_v36 }
  0x2f   :  { %220 = vmatpush.msra.mxu2 %v143_v36 }
  0x30   :  { %171 = vmatpush.msrb.mxu0 %v142_v40 }
  0x31   :  { %221 = vmatpush.msra.mxu2 %v142_v40 }
  0x32   :  { %172 = vmatpush.msrb.mxu0 %v141_v41 }
  0x33   :  { %222 = vmatpush.msra.mxu2 %v141_v41 }
  0x34   :  { %173 = vmatpush.msrb.mxu0 %v140_v42 }
  0x35   :  { %223 = vmatpush.msra.mxu2 %v140_v42 }
  0x8e   :  { %v89_v32 = vpop.f32.mrf.mxu0 }
  0x8f   :  { %v90_v33 = vadd.f32 %v229_v29, %v89_v32 }
  0x91   :  { %v95_v35 = vmax.f32 %v90_v33, 0.0 }
  0x93   :  { %131 = vmatmul.f32.vlgmr.msra.gmra.mxu1 %v95_v35 }
  0x96   :  { %v92_v37 = vpop.f32.mrf.mxu0 }
  0x97   :  { %v93_v38 = vadd.f32 %v229_v29, %v92_v37 }
  0x99   :  { %v96_v39 = vmax.f32 %v93_v38, 0.0 }
  0x9b   :  { %134 = vmatmul.f32.vlgmr.msra.gmra.mxu3 %v96_v39 }
 0x110   :  { %v132_v44 = vpop.f32.mrf.mxu1 }
 0x111   :  { %v133_v45 = vadd.f32 %v230_v43, %v132_v44 }
 0x113   :  { %v138_v46 = vmax.f32 %v133_v45, 0.0 }
 0x115   :  { %174 = vmatmul.f32.vlgmr.msrb.gmra.mxu0 %v138_v46 }
 0x11e   :  { %v135_v47 = vpop.f32.mrf.mxu3 }
 0x11f   :  { %v136_v48 = vadd.f32 %v230_v43, %v135_v47 }
 0x121   :  { %v139_v49 = vmax.f32 %v136_v48, 0.0 }
 0x123   :  { %177 = vmatmul.f32.vlgmr.msra.gmra.mxu2 %v139_v49 }
 0x192   :  { %v175_v51 = vpop.f32.mrf.mxu0 }
 0x193   :  { %v176_v52 = vadd.f32 %v231_v50, %v175_v51 }
 0x195   :  { %182 = vst.msk [vmem:[%s353_s3] sm:$0xff] %vm181_vm1, %v176_v52 }
 0x1a6   :  { %v178_v53 = vpop.f32.mrf.mxu2 }
 0x1a7   :  { %v179_v54 = vadd.f32 %v231_v50, %v178_v53 }
 0x1a9   :  { %183 = vst.msk [vmem:[%s353_s3 + $0x8] sm:$0xff] %vm181_vm1, %v179_v54 }
 0x1aa   :  { %188 = vsyncpa [#allocation3], 1 }
 0x1ab   :  { %189 = vsyncpa [#allocation5], 1 }

</bundles_post_ra>
